<compile_context>
chip_gen: v5e
topology: v5e:2x2
jax: 0.10.0
libtpu: 0.0.40
codegen_flags: <defaults>
</compile_context>

<pallas_src>
import jax
import jax.numpy as jnp
from jax.experimental import pallas as pl
from jax.experimental.pallas import tpu as pltpu


def _readout_kernel(ss_ref, x0_ref, x1_ref, x2_ref,
                    w0_ref, w1_ref, wa_ref, wb_ref, o_ref):
    scale = ss_ref[0]
    shift = ss_ref[1]

    # Contract the trailing (channel) axes of both operands: A @ B^T.  With a
    # (1, C) row-vector LHS the per-node result is already lane-major,
    # i.e. (1, tile_n).
    dn = (((1,), (1,)), ((), ()))

    # Linear readouts for interaction layers 0..L-2 (scalar channels only).
    y = jax.lax.dot_general(w0_ref[...], x0_ref[...], dn,
                            preferred_element_type=jnp.float32)
    y = y + jax.lax.dot_general(w1_ref[...], x1_ref[...], dn,
                                preferred_element_type=jnp.float32)

    # NonLinearReadoutBlock for the last layer: Linear -> SiLU -> Linear.
    h = jnp.dot(x2_ref[...], wa_ref[...], preferred_element_type=jnp.float32)
    h = h * jax.nn.sigmoid(h)              # SiLU (e3nn Activation on 0e scalars)
    y = y + jax.lax.dot_general(wb_ref[...], h, dn,
                                preferred_element_type=jnp.float32)

    # ScaleShiftBlock; store as a lane-dense (1, tile_n) row.
    o_ref[...] = (scale * y + shift).astype(o_ref.dtype)


def _pick_tile_n(n, max_tile):
    # Large tiles amortize per-grid-step overhead; aim for >= 2 grid steps so
    # both v7x TensorCores run.  Always a power of two (sublane aligned).
    if n <= 8:
        return 8
    return int(min(max_tile, max(8, pl.next_power_of_2(n) // 2)))


def readout_head(node_feats, weights, *, scale, shift, max_tile=1024):
    """node_feats: tuple of 3 arrays [N, C_i]; weights: (w0, w1, wa, wb)."""
    x0, x1, x2 = node_feats
    w0, w1, wa, wb = weights
    N = x0.shape[0]

    tile_n = _pick_tile_n(N, max_tile)       # v6e/v5e can raise max_tile further
    num_tiles = pl.cdiv(N, tile_n)
    n_pad = num_tiles * tile_n

    def pad_rows(x):
        if x.shape[0] == n_pad:
            return x
        return jnp.pad(x, ((0, n_pad - x.shape[0]), (0, 0)))

    x0p, x1p, x2p = pad_rows(x0), pad_rows(x1), pad_rows(x2)

    # Width-1 readout weights as row vectors for the A @ B^T formulation.
    w0r = w0.reshape(1, -1).astype(jnp.float32)
    w1r = w1.reshape(1, -1).astype(jnp.float32)
    wbr = wb.reshape(1, -1).astype(jnp.float32)
    waf = wa.astype(jnp.float32)

    # scale/shift live in SMEM -> no recompile per distinct value.
    ss = jnp.array([scale, shift], dtype=jnp.float32)

    feat_spec = lambda c: pl.BlockSpec((tile_n, c), lambda i: (i, 0))
    full_spec = lambda shp: pl.BlockSpec(shp, lambda i: (0, 0))

    out = pl.pallas_call(
        _readout_kernel,
        out_shape=jax.ShapeDtypeStruct((num_tiles, 1, tile_n), jnp.float32),
        grid_spec=pltpu.PrefetchScalarGridSpec(
            num_scalar_prefetch=0,
            grid=(num_tiles,),
            in_specs=[
                pl.BlockSpec(memory_space=pltpu.MemorySpace.SMEM),  # [scale, shift]
                feat_spec(x0p.shape[1]),
                feat_spec(x1p.shape[1]),
                feat_spec(x2p.shape[1]),
                full_spec(w0r.shape),
                full_spec(w1r.shape),
                full_spec(waf.shape),
                full_spec(wbr.shape),
            ],
            out_specs=pl.BlockSpec((None, 1, tile_n), lambda i: (i, 0, 0)),
        ),
        compiler_params=pltpu.CompilerParams(
            dimension_semantics=("parallel",)),
    )(ss, x0p, x1p, x2p, w0r, w1r, waf, wbr)

    # (num_tiles, 1, tile_n) -> node-ordered flat vector -> (N, 1)
    return out.reshape(-1)[:N].reshape(N, 1)


def _reference(node_feats, weights, scale, shift):
    x0, x1, x2 = node_feats
    w0, w1, wa, wb = weights
    y0 = x0 @ w0
    y1 = x1 @ w1
    h = x2 @ wa
    h = h * jax.nn.sigmoid(h)
    y2 = h @ wb
    return scale * (y0 + y1 + y2) + shift


if __name__ == "__main__":
    # Small, MACE-like shapes: 3 interaction layers, 32 scalar channels each,
    # mlp hidden = 16, scalar ("1x0e") output.  N deliberately NOT a multiple
    # of the tile size to exercise the padding path.
    N = 120       # number of nodes (atoms)
    C = 32        # scalar (0e) channels per layer
    M = 16        # mlp_irreps hidden size
    OUT = 1       # out_irreps = "1x0e"
    scaling_std, scaling_mean = 1.5, -0.25

    key = jax.random.PRNGKey(0)
    k = jax.random.split(key, 8)

    x0 = jax.random.normal(k[0], (N, C), dtype=jnp.float32)
    x1 = jax.random.normal(k[1], (N, C), dtype=jnp.float32)
    x2 = jax.random.normal(k[2], (N, C), dtype=jnp.float32)

    # Deterministic synthetic parameters (e3nn 1/sqrt(fan_in) folded in).
    w0 = jax.random.normal(k[3], (C, OUT), dtype=jnp.float32) / jnp.sqrt(C)
    w1 = jax.random.normal(k[4], (C, OUT), dtype=jnp.float32) / jnp.sqrt(C)
    wa = jax.random.normal(k[5], (C, M), dtype=jnp.float32) / jnp.sqrt(C)
    wb = jax.random.normal(k[6], (M, OUT), dtype=jnp.float32) / jnp.sqrt(M)

    feats = (x0, x1, x2)
    weights = (w0, w1, wa, wb)

    out = readout_head(feats, weights, scale=scaling_std, shift=scaling_mean)
    out = jax.block_until_ready(out)

    ref = _reference(feats, weights, scaling_std, scaling_mean)
    assert out.shape == (N, 1)
    assert jnp.allclose(out, ref, atol=1e-4, rtol=1e-4)

    print("KERNEL_OK")
</pallas_src>

<mosaic_0001>
module attributes {stable_mosaic.version = 11 : i64} {
  func.func @_readout_kernel(%arg0: i32, %arg1: memref<2xf32, #tpu.memory_space<smem>>, %arg2: memref<64x32xf32, #tpu.memory_space<vmem>>, %arg3: memref<64x32xf32, #tpu.memory_space<vmem>>, %arg4: memref<64x32xf32, #tpu.memory_space<vmem>>, %arg5: memref<1x32xf32, #tpu.memory_space<vmem>>, %arg6: memref<1x32xf32, #tpu.memory_space<vmem>>, %arg7: memref<32x16xf32, #tpu.memory_space<vmem>>, %arg8: memref<1x16xf32, #tpu.memory_space<vmem>>, %arg9: memref<1x1x64xf32, #tpu.memory_space<vmem>>) attributes {dimension_semantics = [#tpu.dimension_semantics<parallel>], iteration_bounds = array<i64: 2>, scalar_prefetch = 0 : i64, scratch_operands = 0 : i64, tpu.core_type = #tpu.core_type<tc>, window_params = [{transform_indices = @transform_0, window_bounds = array<i64: 2>}, {transform_indices = @transform_1, window_bounds = array<i64: 64, 32>}, {transform_indices = @transform_2, window_bounds = array<i64: 64, 32>}, {transform_indices = @transform_3, window_bounds = array<i64: 64, 32>}, {pipeline_mode = #tpu.pipeline_mode<synchronous>, transform_indices = @transform_4, window_bounds = array<i64: 1, 32>}, {pipeline_mode = #tpu.pipeline_mode<synchronous>, transform_indices = @transform_5, window_bounds = array<i64: 1, 32>}, {pipeline_mode = #tpu.pipeline_mode<synchronous>, transform_indices = @transform_6, window_bounds = array<i64: 32, 16>}, {pipeline_mode = #tpu.pipeline_mode<synchronous>, transform_indices = @transform_7, window_bounds = array<i64: 1, 16>}, {transform_indices = @transform_8, window_bounds = array<i64: 1, 1, 64>}]} {
    %c0 = arith.constant 0 : index
    %0 = memref.load %arg1[%c0] : memref<2xf32, #tpu.memory_space<smem>>
    %c1 = arith.constant 1 : index
    %1 = memref.load %arg1[%c1] : memref<2xf32, #tpu.memory_space<smem>>
    %c0_0 = arith.constant 0 : index
    %c0_1 = arith.constant 0 : index
    %2 = vector.load %arg5[%c0_0, %c0_1] : memref<1x32xf32, #tpu.memory_space<vmem>>, vector<1x32xf32>
    %c0_2 = arith.constant 0 : index
    %c0_3 = arith.constant 0 : index
    %3 = vector.load %arg2[%c0_2, %c0_3] : memref<64x32xf32, #tpu.memory_space<vmem>>, vector<64x32xf32>
    %cst = arith.constant dense<0.000000e+00> : vector<1x64xf32>
    %4 = tpu.matmul %2, %3, %cst {dimension_numbers = #tpu.dot_dimension_numbers<[1], [1], [0], [0], [0, 0, 1, 0], [], []>} : vector<1x32xf32>, vector<64x32xf32>, vector<1x64xf32> -> vector<1x64xf32>
    %c0_4 = arith.constant 0 : index
    %c0_5 = arith.constant 0 : index
    %5 = vector.load %arg6[%c0_4, %c0_5] : memref<1x32xf32, #tpu.memory_space<vmem>>, vector<1x32xf32>
    %c0_6 = arith.constant 0 : index
    %c0_7 = arith.constant 0 : index
    %6 = vector.load %arg3[%c0_6, %c0_7] : memref<64x32xf32, #tpu.memory_space<vmem>>, vector<64x32xf32>
    %cst_8 = arith.constant dense<0.000000e+00> : vector<1x64xf32>
    %7 = tpu.matmul %5, %6, %cst_8 {dimension_numbers = #tpu.dot_dimension_numbers<[1], [1], [0], [0], [0, 0, 1, 0], [], []>} : vector<1x32xf32>, vector<64x32xf32>, vector<1x64xf32> -> vector<1x64xf32>
    %8 = arith.addf %4, %7 : vector<1x64xf32>
    %c0_9 = arith.constant 0 : index
    %c0_10 = arith.constant 0 : index
    %9 = vector.load %arg4[%c0_9, %c0_10] : memref<64x32xf32, #tpu.memory_space<vmem>>, vector<64x32xf32>
    %c0_11 = arith.constant 0 : index
    %c0_12 = arith.constant 0 : index
    %10 = vector.load %arg7[%c0_11, %c0_12] : memref<32x16xf32, #tpu.memory_space<vmem>>, vector<32x16xf32>
    %cst_13 = arith.constant dense<0.000000e+00> : vector<64x16xf32>
    %11 = tpu.matmul %9, %10, %cst_13 {dimension_numbers = #tpu.dot_dimension_numbers<[1], [0], [0], [1], [0, 0, 1, 1], [], []>} : vector<64x32xf32>, vector<32x16xf32>, vector<64x16xf32> -> vector<64x16xf32>
    %12 = arith.negf %11 : vector<64x16xf32>
    %13 = math.exp %12 : vector<64x16xf32>
    %cst_14 = arith.constant 1.000000e+00 : f32
    %14 = vector.broadcast %cst_14 : f32 to vector<64x16xf32>
    %15 = arith.addf %14, %13 : vector<64x16xf32>
    %16 = arith.divf %14, %15 : vector<64x16xf32>
    %17 = arith.mulf %11, %16 : vector<64x16xf32>
    %c0_15 = arith.constant 0 : index
    %c0_16 = arith.constant 0 : index
    %18 = vector.load %arg8[%c0_15, %c0_16] : memref<1x16xf32, #tpu.memory_space<vmem>>, vector<1x16xf32>
    %cst_17 = arith.constant dense<0.000000e+00> : vector<1x64xf32>
    %19 = tpu.matmul %18, %17, %cst_17 {dimension_numbers = #tpu.dot_dimension_numbers<[1], [1], [0], [0], [0, 0, 1, 0], [], []>} : vector<1x16xf32>, vector<64x16xf32>, vector<1x64xf32> -> vector<1x64xf32>
    %20 = arith.addf %8, %19 : vector<1x64xf32>
    %21 = vector.broadcast %0 : f32 to vector<1x64xf32>
    %22 = arith.mulf %21, %20 : vector<1x64xf32>
    %23 = vector.broadcast %1 : f32 to vector<1x64xf32>
    %24 = arith.addf %22, %23 : vector<1x64xf32>
    %c0_18 = arith.constant 0 : index
    %c0_19 = arith.constant 0 : index
    %c0_20 = arith.constant 0 : index
    %25 = vector.load %arg9[%c0_18, %c0_19, %c0_20] : memref<1x1x64xf32, #tpu.memory_space<vmem>>, vector<1x1x64xf32>
    %26 = vector.shape_cast %25 : vector<1x1x64xf32> to vector<1x64xf32>
    %27 = vector.shape_cast %24 : vector<1x64xf32> to vector<1x1x64xf32>
    tpu.vector_store %arg9[%c0_18, %c0_19, %c0_20], %27 {strides = array<i32>} : memref<1x1x64xf32, #tpu.memory_space<vmem>>, vector<1x1x64xf32>,
    return
  }
  func.func @transform_0(%arg0: i32) -> i32 {
    %c0_i32 = arith.constant 0 : i32
    %c0_i32_0 = arith.constant 0 : i32
    return %c0_i32 : i32
  }
  func.func @transform_1(%arg0: i32) -> (i32, i32) {
    %c0_i32 = arith.constant 0 : i32
    %c0_i32_0 = arith.constant 0 : i32
    return %arg0, %c0_i32 : i32, i32
  }
  func.func @transform_2(%arg0: i32) -> (i32, i32) {
    %c0_i32 = arith.constant 0 : i32
    %c0_i32_0 = arith.constant 0 : i32
    return %arg0, %c0_i32 : i32, i32
  }
  func.func @transform_3(%arg0: i32) -> (i32, i32) {
    %c0_i32 = arith.constant 0 : i32
    %c0_i32_0 = arith.constant 0 : i32
    return %arg0, %c0_i32 : i32, i32
  }
  func.func @transform_4(%arg0: i32) -> (i32, i32) {
    %c0_i32 = arith.constant 0 : i32
    %c0_i32_0 = arith.constant 0 : i32
    %c0_i32_1 = arith.constant 0 : i32
    return %c0_i32, %c0_i32_0 : i32, i32
  }
  func.func @transform_5(%arg0: i32) -> (i32, i32) {
    %c0_i32 = arith.constant 0 : i32
    %c0_i32_0 = arith.constant 0 : i32
    %c0_i32_1 = arith.constant 0 : i32
    return %c0_i32, %c0_i32_0 : i32, i32
  }
  func.func @transform_6(%arg0: i32) -> (i32, i32) {
    %c0_i32 = arith.constant 0 : i32
    %c0_i32_0 = arith.constant 0 : i32
    %c0_i32_1 = arith.constant 0 : i32
    return %c0_i32, %c0_i32_0 : i32, i32
  }
  func.func @transform_7(%arg0: i32) -> (i32, i32) {
    %c0_i32 = arith.constant 0 : i32
    %c0_i32_0 = arith.constant 0 : i32
    %c0_i32_1 = arith.constant 0 : i32
    return %c0_i32, %c0_i32_0 : i32, i32
  }
  func.func @transform_8(%arg0: i32) -> (i32, i32, i32) {
    %c0_i32 = arith.constant 0 : i32
    %c0_i32_0 = arith.constant 0 : i32
    %c0_i32_1 = arith.constant 0 : i32
    return %arg0, %c0_i32, %c0_i32_0 : i32, i32, i32
  }
}

</mosaic_0001>

<bundles_post_ra>
// kernel: tpu_custom_call.1
= control target key start
LH: loop header
LB: loop body
LE: loop exit
PB: predicated region body
PF: predicated region fallthrough
CT: control target
= control target key end

     0   :  { %13 = vsyncpa [#allocation4], 0  ;;  %s1480_s0 = inlined_call_operand.vmem [shape: f32[2], index: 0, kind: input, shape index: {}]   ;;  %s1481_s1 = inlined_call_operand.vmem [shape: f32[128,32], index: 1, kind: input, shape index: {}]   ;;  %s1482_s2 = inlined_call_operand.vmem [shape: f32[128,32], index: 2, kind: input, shape index: {}]   ;;  %s1483_s3 = inlined_call_operand.vmem [shape: f32[128,32], index: 3, kind: input, shape index: {}]   ;;  %s1484_s4 = inlined_call_operand.vmem [shape: f32[1,32], index: 4, kind: input, shape index: {}]   ;;  %s1485_s5 = inlined_call_operand.vmem [shape: f32[1,32], index: 5, kind: input, shape index: {}]   ;;  %s1486_s6 = inlined_call_operand.vmem [shape: f32[32,16], index: 6, kind: input, shape index: {}]   ;;  %s1487_s7 = inlined_call_operand.vmem [shape: f32[1,16], index: 7, kind: input, shape index: {}]   ;;  %s1488_s8 = inlined_call_operand.hbm [shape: f32[2,1,64], index: 8, kind: output, shape index: {}]  }
   0x1   :  { %14 = vsyncpa [#allocation3], 0 }
   0x2   :  { %16 = vsyncpa [#allocation3 + $0x1], 0  ;;  %s1152_s27 = smov 0   ;;  %s1154_s28 = smov 0  }
   0x3   :  { %s1156_s29 = smov 0   ;;  %s1158_s30 = smov 0  }
   0x4 LB: > { %s1173_s9 = sadd.s32 4294967295, %s1104_s30   ;;  %s875_s10 = sadd.s32 4294967294, %s1104_s30   ;;  %s1104_s30 = sphi %s1158_s30, %s1502_s30   ;;  %s1100_s29 = sphi %s1156_s29, %s1501_s29   ;;  %s1096_s28 = sphi %s1154_s28, %s1500_s28   ;;  %s1092_s27 = sphi %s1152_s27, %s1499_s27  }
   0x5   : > { %s1177_s11 = sadd.s32 1, %s1104_s30   ;;  %s212_s12 = sadd.s32 1, %s1100_s29 }
   0x6   : > { %s209_s13 = ssub.s32 %s1104_s30, %s1177_s11  ;;  %p222_p0 = scmp.ne.s32.totalorder %s1100_s29, %s1096_s28 }
   0x7   : > { %p210_p1 = scmp.eq.s32.totalorder %s209_s13, 0  ;;  %p223_p2 = scmp.eq.s32.totalorder %s1173_s9, 1 }
   0x8   : > { %p228_p3 = scmp.ne.s32.totalorder %s1096_s28, %s1092_s27  ;;  %p229_p4 = scmp.eq.s32.totalorder %s875_s10, 1 }
   0x9   : > { %s1188_s14 = scalar_select %p210_p1, %s1100_s29, %s212_s12  }
   0xa   : > { %p1190_p5 = por %p223_p2, %p222_p0  ;;  %p1194_p6 = por %p229_p4, %p228_p3 }
   0xb   : > { %p876_p7 = scmp.ge.s32.totalorder %s1104_s30, 1  ;;  %p236_p8 = scmp.lt.s32.totalorder %s1104_s30, 3 }
   0xc   : > { %p955_p9 = scmp.eq.s32.totalorder %s1173_s9, 0  ;;  %s248_s19 = sshll.u32 %s1480_s0, 4  ;;  %s249_s19 = int_to_ptr.vmem [resolvable:$true] %s248_s19 }
   0xd   : > { %p237_p10 = pnand %p876_p7, %p236_p8  ;;  %s1106_s20 = smov [#allocation2]  }
   0xf   : > { %p947_p11 = pneg %p237_p10  ;;  %300 = sbr.rel (%p237_p10) target bundleno = 389 (0x185), region = 52 }
  0x11   : > { %p948_p12 = pnand %p955_p9, %p947_p11 }
  0x13   : > { %950 = dma.vmem_to_smem (!%p948_p12), %s249_s19, 16, %s1106_s20, [#allocation4]  }
  0x14   : > { %1083 = dma.done.wait (%p955_p9), [#allocation4], 16  }
  0x15   : > { %1085 = vsyncadd (%p955_p9), [#allocation4], 4294967280 }
  0x16   : > { %307 = sfence }
  0x17   : > { %v1207_v0 = vld [vmem:[%s1486_s6 + $0x18] sm:$0xff]  ;;  %v1212_v1 = vld [vmem:[%s1486_s6 + $0x10] sm:$0xff]  ;;  %s881_s25 = sshll.u32 %s1173_s9, 3  ;;  %v1220_v2 = vld [vmem:[%s1486_s6 + $0x8] sm:$0xff]  ;;  %vm383_vm0 = vcmask 261120   ;;  %vm716_vm9 = vcmask 130048  }
  0x18   : > { %933 = vmatpush.msra.mxu2 %v1207_v0  ;;  %934 = vmatpush.msra.mxu3 %v1207_v0  ;;  %p346_p13 = scmp.lt.s32.totalorder %s881_s25, 15  ;;  %v1227_v3 = vld [vmem:[%s1486_s6] sm:$0xff]  ;;  %s887_s21 = sld [smem:[#allocation2 + $0x1]] }
  0x19   : > { %v374_v25 = vld [vmem:[%s1485_s5] sm:$0x1]  ;;  %s343_s22 = sand.u32 1, %s1096_s28  }
  0x1a   : > { %935 = vmatpush.msra.mxu2 %v1212_v1  ;;  %936 = vmatpush.msra.mxu3 %v1212_v1  ;;  %s1504_s25 = smov (!%p346_p13, %s881_s25), 15  ;;  %v365_v28 = vld [vmem:[%s1484_s4] sm:$0x1]  ;;  %s772_s13 = scalar_lea.sflag [#allocation3], %s343_s22 }
  0x1b   : > { %s882_s17 = sshll.u32 %s1504_s25, 3  ;;  %s780_s25 = scalar_lea.hbm %s1488_s8, %s1173_s9 }
  0x1c   : > { %937 = vmatpush.msra.mxu2 %v1220_v2  ;;  %938 = vmatpush.msra.mxu3 %v1220_v2  ;;  %s1234_s20 = scalar_lea.vmem %s1482_s2, %s882_s17  ;;  %s1239_s23 = scalar_lea.vmem %s1483_s3, %s882_s17 }
  0x1d   : > { %v382_v4 = vld [vmem:[%s1234_s20 + $0x38] sm:$0xff]  ;;  %v479_v5 = vld [vmem:[%s1239_s23 + $0x8] sm:$0xff]  ;;  %v484_v6 = vld [vmem:[%s1239_s23 + $0x30] sm:$0xff]  ;;  %s1249_s26 = scalar_lea.vmem %s1481_s1, %s882_s17  ;;  %s784_s12 = sshll.u32 %s780_s25, 4  ;;  %s785_s12 = int_to_ptr.hbm [resolvable:$true] %s784_s12 }
  0x1e   : > { %939 = vmatpush.msra.mxu2 %v1227_v3  ;;  %940 = vmatpush.msra.mxu3 %v1227_v3  ;;  %v381_v7 = vld [vmem:[%s1234_s20 + $0x30] sm:$0xff]  ;;  %v373_v8 = vld [vmem:[%s1249_s26 + $0x38] sm:$0xff]  ;;  %v380_v10 = vld [vmem:[%s1234_s20 + $0x28] sm:$0xff]  ;;  %s1052_s17 = sshra.s32 %s785_s12, 4  ;;  %s1053_s17 = int_to_ptr.hbm [resolvable:$true] %s1052_s17 }
  0x1f   : > { %888 = vmatpush.xpose.msk.msra.mxu0 %vm383_vm0, %v382_v4  ;;  %907 = vmatmul.msk.f32.vlgmr.msra.gmra.mxu2 %vm383_vm0, %v479_v5  ;;  %v372_v9 = vld [vmem:[%s1249_s26 + $0x30] sm:$0xff]  ;;  %v485_v12 = vld [vmem:[%s1239_s23 + $0x38] sm:$0xff]  ;;  %v371_v13 = vld [vmem:[%s1249_s26 + $0x28] sm:$0xff]  ;;  %s1054_s18 = scalar_lea.hbm %s1053_s17, 1  ;;  %p1059_p3 = scmp.lt.s32.totalorder %s1053_s17, %s1488_s8 }
  0x20   : > { %912 = vmatmul.msk.f32.vlgmr.msra.gmra.mxu3 %vm383_vm0, %v484_v6  ;;  %897 = vmatpush.xpose.msk.msra.mxu1 %vm383_vm0, %v373_v8  ;;  %v480_v11 = vld [vmem:[%s1239_s23 + $0x10] sm:$0xff]  ;;  %v379_v14 = vld [vmem:[%s1234_s20 + $0x20] sm:$0xff]  ;;  %v378_v16 = vld [vmem:[%s1234_s20 + $0x18] sm:$0xff]  ;;  %p1055_p0 = scmp.ne.s32.totalorder %s1053_s17, %s1054_s18 }
  0x21   : > { %v370_v15 = vld [vmem:[%s1249_s26 + $0x20] sm:$0xff]  ;;  %v481_v17 = vld [vmem:[%s1239_s23 + $0x18] sm:$0xff]  ;;  %v377_v19 = vld [vmem:[%s1234_s20 + $0x10] sm:$0xff] }
  0x22   : > { %v369_v18 = vld [vmem:[%s1249_s26 + $0x18] sm:$0xff]  ;;  %v368_v20 = vld [vmem:[%s1249_s26 + $0x10] sm:$0xff]  ;;  %v376_v21 = vld [vmem:[%s1234_s20 + $0x8] sm:$0xff]  ;;  %p1056_p1 = pnand %p1055_p0, %p1190_p5 }
  0x23   : > { %889 = vmatpush.xpose.msk.msra.mxu0 %vm383_vm0, %v381_v7  ;;  %v482_v22 = vld [vmem:[%s1239_s23 + $0x20] sm:$0xff]  ;;  %v367_v23 = vld [vmem:[%s1249_s26 + $0x8] sm:$0xff] }
  0x24   : > { %898 = vmatpush.xpose.msk.msra.mxu1 %vm383_vm0, %v372_v9  ;;  %v375_v24 = vld [vmem:[%s1234_s20] sm:$0xff]  ;;  %v483_v27 = vld [vmem:[%s1239_s23 + $0x28] sm:$0xff]  ;;  %s363_s20 = sld [smem:[#allocation2]]  ;;  %p1057_p2 = pneg %p1056_p1 }
  0x25   : > { %v366_v26 = vld [vmem:[%s1249_s26] sm:$0xff]  ;;  %s344_s26 = scalar_lea.vmem [#allocation5], %s343_s22 }
  0x26   : > { %v478_v29 = vld [vmem:[%s1239_s23] sm:$0xff]  ;;  %s782_s10 = sshll.u32 %s344_s26, 4  ;;  %s783_s10 = int_to_ptr.vmem [resolvable:$true] %s782_s10 }
  0x27   : > { %890 = vmatpush.xpose.msk.msra.mxu0 %vm383_vm0, %v380_v10  ;;  %908 = vmatmul.msk.f32.gmra.mxu2 %vm383_vm0, %v480_v11 }
  0x28   : > { %913 = vmatmul.msk.f32.gmra.mxu3 %vm383_vm0, %v485_v12  ;;  %899 = vmatpush.xpose.msk.msra.mxu1 %vm383_vm0, %v371_v13 }
  0x2b   : > { %891 = vmatpush.xpose.msk.msra.mxu0 %vm383_vm0, %v379_v14 }
  0x2c   : > { %900 = vmatpush.xpose.msk.msra.mxu1 %vm383_vm0, %v370_v15 }
  0x2f   : > { %892 = vmatpush.xpose.msk.msra.mxu0 %vm383_vm0, %v378_v16  ;;  %909 = vmatmul.msk.f32.gmra.mxu2 %vm383_vm0, %v481_v17 }
  0x30   : > { %901 = vmatpush.xpose.msk.msra.mxu1 %vm383_vm0, %v369_v18 }
  0x33   : > { %893 = vmatpush.xpose.msk.msra.mxu0 %vm383_vm0, %v377_v19 }
  0x34   : > { %902 = vmatpush.xpose.msk.msra.mxu1 %vm383_vm0, %v368_v20 }
  0x37   : > { %894 = vmatpush.xpose.msk.msra.mxu0 %vm383_vm0, %v376_v21  ;;  %910 = vmatmul.msk.f32.gmra.mxu2 %vm383_vm0, %v482_v22 }
  0x38   : > { %903 = vmatpush.xpose.msk.msra.mxu1 %vm383_vm0, %v367_v23 }
  0x3b   : > { %895 = vmatpush.xpose.msk.msra.mxu0 %vm383_vm0, %v375_v24 }
  0x3c   : > { %904 = vmatpush.xpose.msk.msra.mxu1 %vm383_vm0, %v366_v26 }
  0x3e   : > { %896 = vmatmul.msk.f32.vlgmr.msra.gmra.mxu0 %vm383_vm0, %v374_v25 }
  0x3f   : > { %526 = vmatpush.msrb.mxu0 %v1207_v0  ;;  %911 = vmatmul.msk.f32.gmra.mxu2 %vm383_vm0, %v483_v27 }
  0x40   : > { %905 = vmatmul.msk.f32.vlgmr.msra.gmra.mxu1 %vm383_vm0, %v365_v28 }
  0x41   : > { %527 = vmatpush.msrb.mxu0 %v1212_v1 }
  0x43   : > { %528 = vmatpush.msrb.mxu0 %v1220_v2 }
  0x45   : > { %529 = vmatpush.msrb.mxu0 %v1227_v3 }
  0x46   : > { %906 = vmatmul.msk.f32.vlgmr.msrb.gmra.mxu0 %vm383_vm0, %v478_v29 }
  0xa2   : > { %v1308_v30 = vpop.f32.mrf.mxu2 }
  0xa3   : > { %v1310_v31 = vpop.f32.mrf.mxu3  ;;  %v915_v48 = vmul.f32 -1.442695, %v1308_v30 }
  0xa4   : > { %v920_v32 = vmul.f32 -1.442695, %v1310_v31 }
  0xa6   : > { %991 = vpow2.f32 %v920_v32 }
  0xaa   : > { %v1313_v33 = vpop.f32.mrf.mxu2 }
  0xab   : > { %v1315_v34 = vpop.f32.mrf.mxu3  ;;  %v916_v44 = vmul.f32 -1.442695, %v1313_v33 }
  0xac   : > { %v992_v35 = vpop.eup %991  ;;  %v921_v36 = vmul.f32 -1.442695, %v1315_v34 }
  0xad   : > { %v585_v37 = vadd.f32 1.0, %v992_v35 }
  0xaf   : > { %993 = vrcp.f32 %v585_v37  ;;  %vm682_vm1 = vweird.f32 %v585_v37  ;;  %v686_v59 = vand.u32 2147483647, %v585_v37  ;;  %v688_v60 = vand.u32 2147483648, %v585_v37 }
  0xb0   : > { %995 = vpow2.f32 %v921_v36 }
  0xb1   : > { %v689_v10 = vor.u32 1.1754944e-38, %v688_v60  ;;  %vm687_vm8 = vcmp.eq.f32.partialorder %v686_v59, 8.507059e+37 }
  0xb2   : > { %v1318_v38 = vpop.f32.mrf.mxu2 }
  0xb3   : > { %v917_v41 = vmul.f32 -1.442695, %v1318_v38 }
  0xb5   : > { %v994_v39 = vpop.eup %993 }
  0xb6   : > { %v996_v40 = vpop.eup %995  ;;  %v678_v43 = vmul.f32 %v994_v39, %v585_v37  ;;  %vm683_vm2 = vweird.f32 %v994_v39 }
  0xb7   : > { %v586_v42 = vadd.f32 1.0, %v996_v40  ;;  %vm1337_vm5 = vmor %vm682_vm1, %vm683_vm2 }
  0xb8   : > { %v679_v49 = vsub.f32 1.0, %v678_v43 }
  0xb9   : > { %997 = vrcp.f32 %v586_v42  ;;  %v703_v54 = vand.u32 2147483648, %v586_v42  ;;  %vm697_vm3 = vweird.f32 %v586_v42  ;;  %v701_v56 = vand.u32 2147483647, %v586_v42 }
  0xba   : > { %999 = vpow2.f32 %v917_v41  ;;  %v1322_v45 = vpop.f32.mrf.mxu2  ;;  %v680_v52 = vmul.f32 %v994_v39, %v679_v49 }
  0xbb   : > { %v918_v46 = vmul.f32 -1.442695, %v1322_v45  ;;  %v1325_v47 = vpop.f32.mrf.mxu0  ;;  %v704_v7 = vor.u32 1.1754944e-38, %v703_v54  ;;  %vm702_vm7 = vcmp.eq.f32.partialorder %v701_v56, 8.507059e+37 }
  0xbc   : > { %v681_v1 = vadd.f32 %v994_v39, %v680_v52 }
  0xbd   : > { %1001 = vpow2.f32 %v918_v46 }
  0xbe   : > { %1003 = vpow2.f32 %v916_v44  ;;  %v685_v12 = vsel %vm1337_vm5, %v994_v39, %v681_v1 }
  0xbf   : > { %v998_v50 = vpop.eup %997  ;;  %1005 = vpow2.f32 %v915_v48  ;;  %v690_v18 = vsel %vm687_vm8, %v689_v10, %v685_v12 }
  0xc0   : > { %v1000_v51 = vpop.eup %999  ;;  %v693_v53 = vmul.f32 %v998_v50, %v586_v42  ;;  %vm698_vm4 = vweird.f32 %v998_v50  ;;  %v713_v24 = vmul.f32 %v690_v18, %v1310_v31 }
  0xc1   : > { %v1330_v61 = vadd.f32 1.0, %v1000_v51  ;;  %vm1346_vm6 = vmor %vm697_vm3, %vm698_vm4 }
  0xc2   : > { %v694_v55 = vsub.f32 1.0, %v693_v53  ;;  %v1328_v57 = vpop.f32.mrf.mxu2 }
  0xc3   : > { %v1002_v58 = vpop.eup %1001  ;;  %v919_v62 = vmul.f32 -1.442695, %v1328_v57  ;;  %v1333_v63 = vpop.f32.mrf.mxu0  ;;  %vm637_vm2 = vweird.f32 %v1330_v61  ;;  %v641_v2 = vand.u32 2147483647, %v1330_v61 }
  0xc4   : > { %v1004_v0 = vpop.eup %1003  ;;  %v695_v3 = vmul.f32 %v998_v50, %v694_v55  ;;  %v1341_v4 = vadd.f32 1.0, %v1002_v58  ;;  %v914_v5 = vmul.f32 -1.442695, %v1333_v63 }
  0xc5   : > { %1007 = vpow2.f32 %v919_v62  ;;  %v1006_v8 = vpop.eup %1005  ;;  %v1351_v11 = vadd.f32 1.0, %v1004_v0  ;;  %v643_v62 = vand.u32 2147483648, %v1330_v61 }
  0xc6   : > { %v696_v9 = vadd.f32 %v998_v50, %v695_v3  ;;  %1009 = vrcp.f32 %v1341_v4  ;;  %v1358_v14 = vadd.f32 1.0, %v1006_v8  ;;  %vm652_vm12 = vweird.f32 %v1341_v4 }
  0xc7   : > { %1011 = vrcp.f32 %v1330_v61  ;;  %v658_v49 = vand.u32 2147483648, %v1341_v4  ;;  %v656_v52 = vand.u32 2147483647, %v1341_v4 }
  0xc8   : > { %v700_v13 = vsel %vm1346_vm6, %v998_v50, %v696_v9  ;;  %1013 = vpow2.f32 %v914_v5  ;;  %v644_v9 = vor.u32 1.1754944e-38, %v643_v62  ;;  %vm622_vm6 = vweird.f32 %v1351_v11 }
  0xc9   : > { %v705_v15 = vsel %vm702_vm7, %v704_v7, %v700_v13  ;;  %1015 = vrcp.f32 %v1351_v11  ;;  %v659_v0 = vor.u32 1.1754944e-38, %v658_v49  ;;  %vm657_vm3 = vcmp.eq.f32.partialorder %v656_v52, 8.507059e+37 }
  0xca   : > { %v714_v16 = vmul.f32 %v705_v15, %v1315_v34  ;;  %1017 = vrcp.f32 %v1358_v14  ;;  %vm642_vm7 = vcmp.eq.f32.partialorder %v641_v2, 8.507059e+37 }
  0xcb   : > { %v1008_v17 = vpop.eup %1007 }
  0xcc   : > { %v1010_v19 = vpop.eup %1009  ;;  %v584_v20 = vadd.f32 1.0, %v1008_v17  ;;  %922 = vmatpush.xpose.msk.msrb.mxu3 %vm716_vm9, %v714_v16 }
  0xcd   : > { %v1363_v21 = vpop.eup %1011  ;;  %v648_v22 = vmul.f32 %v1010_v19, %v1341_v4  ;;  %vm653_vm10 = vweird.f32 %v1010_v19 }
  0xce   : > { %v1014_v23 = vpop.eup %1013  ;;  %1019 = vrcp.f32 %v584_v20  ;;  %v633_v25 = vmul.f32 %v1363_v21, %v1330_v61  ;;  %v673_v42 = vand.u32 2147483648, %v584_v20  ;;  %v671_v46 = vand.u32 2147483647, %v584_v20  ;;  %vm1387_vm13 = vmor %vm652_vm12, %vm653_vm10 }
  0xcf   : > { %v1370_v26 = vadd.f32 1.0, %v1014_v23  ;;  %v1373_v27 = vpop.eup %1015  ;;  %v649_v28 = vsub.f32 1.0, %v648_v22  ;;  %vm667_vm14 = vweird.f32 %v584_v20  ;;  %vm638_vm15 = vweird.f32 %v1363_v21 }
  0xd0   : > { %923 = vmatpush.xpose.msk.msrb.mxu3 %vm716_vm9, %v713_v24  ;;  %v1375_v29 = vpop.eup %1017  ;;  %v618_v34 = vmul.f32 %v1373_v27, %v1351_v11  ;;  %v634_v35 = vsub.f32 1.0, %v633_v25  ;;  %v674_v56 = vor.u32 1.1754944e-38, %v673_v42  ;;  %vm672_vm1 = vcmp.eq.f32.partialorder %v671_v46, 8.507059e+37  ;;  %vm639_vm4 = vmor %vm637_vm2, %vm638_vm15 }
  0xd1   : > { %1021 = vrcp.f32 %v1370_v26  ;;  %v650_v31 = vmul.f32 %v1010_v19, %v649_v28  ;;  %v603_v37 = vmul.f32 %v1375_v29, %v1358_v14  ;;  %vm623_vm5 = vweird.f32 %v1373_v27 }
  0xd2   : > { %v619_v40 = vsub.f32 1.0, %v618_v34  ;;  %v635_v41 = vmul.f32 %v1363_v21, %v634_v35  ;;  %v628_v61 = vand.u32 2147483648, %v1351_v11  ;;  %vm1414_vm8 = vmor %vm622_vm6, %vm623_vm5  ;;  %vm608_vm10 = vweird.f32 %v1375_v29  ;;  %v475_v34 = vpop.f32.mrf.mxu1 }
  0xd3   : > { %v651_v43 = vadd.f32 %v1010_v19, %v650_v31  ;;  %v604_v50 = vsub.f32 1.0, %v603_v37  ;;  %v596_v24 = vand.u32 2147483647, %v1370_v26  ;;  %v476_v35 = vadd.f32 %v475_v34, %v1325_v47 }
  0xd4   : > { %v1020_v32 = vpop.eup %1019  ;;  %v620_v54 = vmul.f32 %v1373_v27, %v619_v40  ;;  %v636_v55 = vadd.f32 %v1363_v21, %v635_v41  ;;  %v629_v18 = vor.u32 1.1754944e-38, %v628_v61 }
  0xd5   : > { %v663_v36 = vmul.f32 %v1020_v32, %v584_v20  ;;  %vm668_vm11 = vweird.f32 %v1020_v32  ;;  %v655_v58 = vsel %vm1387_vm13, %v1010_v19, %v651_v43  ;;  %v605_v4 = vmul.f32 %v1375_v29, %v604_v50 }
  0xd6   : > { %vm669_vm0 = vmor %vm667_vm14, %vm668_vm11  ;;  %v660_v5 = vsel %vm657_vm3, %v659_v0, %v655_v58  ;;  %v621_v6 = vadd.f32 %v1373_v27, %v620_v54  ;;  %v640_v7 = vsel %vm639_vm4, %v1363_v21, %v636_v55  ;;  %vm607_vm11 = vweird.f32 %v1358_v14 }
  0xd7   : > { %v664_v39 = vsub.f32 1.0, %v663_v36  ;;  %v1383_v48 = vpop.eup %1021  ;;  %v711_v10 = vmul.f32 %v660_v5, %v1322_v45  ;;  %v645_v13 = vsel %vm642_vm7, %v644_v9, %v640_v7  ;;  %v606_v15 = vadd.f32 %v1375_v29, %v605_v4  ;;  %vm609_vm15 = vmor %vm607_vm11, %vm608_vm10 }
  0xd8   : > { %v588_v60 = vmul.f32 %v1383_v48, %v1370_v26  ;;  %v625_v16 = vsel %vm1414_vm8, %v1373_v27, %v621_v6  ;;  %v611_v45 = vand.u32 2147483647, %v1358_v14  ;;  %v710_v19 = vmul.f32 %v645_v13, %v1318_v38 }
  0xd9   : > { %v665_v44 = vmul.f32 %v1020_v32, %v664_v39  ;;  %vm592_vm13 = vweird.f32 %v1370_v26  ;;  %vm593_vm14 = vweird.f32 %v1383_v48  ;;  %v598_v21 = vand.u32 2147483648, %v1370_v26 }
  0xda   : > { %v589_v8 = vsub.f32 1.0, %v588_v60  ;;  %v610_v22 = vsel %vm609_vm15, %v1375_v29, %v606_v15  ;;  %vm597_vm2 = vcmp.eq.f32.partialorder %v596_v24, 8.507059e+37  ;;  %v767_v36 = vstv %s887_s21 }
  0xdb   : > { %v666_v53 = vadd.f32 %v1020_v32, %v665_v44  ;;  %v599_v27 = vor.u32 1.1754944e-38, %v598_v21 }
  0xdc   : > { %v590_v17 = vmul.f32 %v1383_v48, %v589_v8 }
  0xdd   : > { %v670_v59 = vsel %vm669_vm0, %v1020_v32, %v666_v53  ;;  %vm594_vm0 = vmor %vm592_vm13, %vm593_vm14 }
  0xde   : > { %v675_v1 = vsel %vm672_vm1, %v674_v56, %v670_v59  ;;  %v591_v23 = vadd.f32 %v1383_v48, %v590_v17  ;;  %vm612_vm1 = vcmp.eq.f32.partialorder %v611_v45, 8.507059e+37 }
  0xdf   : > { %v712_v3 = vmul.f32 %v675_v1, %v1328_v57  ;;  %v626_v57 = vand.u32 2147483647, %v1351_v11  ;;  %v613_v11 = vand.u32 2147483648, %v1358_v14 }
  0xe0   : > { %v595_v28 = vsel %vm594_vm0, %v1383_v48, %v591_v23 }
  0xe1   : > { %924 = vmatpush.xpose.msk.msrb.mxu3 %vm716_vm9, %v712_v3  ;;  %vm627_vm12 = vcmp.eq.f32.partialorder %v626_v57, 8.507059e+37  ;;  %v614_v14 = vor.u32 1.1754944e-38, %v613_v11  ;;  %v600_v32 = vsel %vm597_vm2, %v599_v27, %v595_v28 }
  0xe2   : > { %v630_v20 = vsel %vm627_vm12, %v629_v18, %v625_v16  ;;  %v707_v26 = vmul.f32 %v600_v32, %v1333_v63  ;;  %v765_v63 = vstv %s363_s20  ;;  %s1058_s20 = scalar_lea.hbm %s1488_s8, 2 }
  0xe3   : > { %v709_v38 = vmul.f32 %v630_v20, %v1313_v33  ;;  %v615_v25 = vsel %vm612_vm1, %v614_v14, %v610_v22  ;;  %v715_v33 = vld [vmem:[%s1487_s7] sm:$0x1]  ;;  %p1060_p4 = scmp.lt.s32.totalorder %s1058_s20, %s1054_s18 }
  0xe4   : > { %v708_v29 = vmul.f32 %v615_v25, %v1308_v30 }
  0xe5   : > { %925 = vmatpush.xpose.msk.msrb.mxu3 %vm716_vm9, %v711_v10  ;;  %p1061_p7 = por %p1060_p4, %p1059_p3 }
  0xe7   : > { %p1062_p8 = pnand %p1061_p7, %p1057_p2 }
  0xe9   : > { %926 = vmatpush.xpose.msk.msrb.mxu3 %vm716_vm9, %v710_v19 }
  0xed   : > { %927 = vmatpush.xpose.msk.msrb.mxu3 %vm716_vm9, %v709_v38 }
  0xf1   : > { %928 = vmatpush.xpose.msk.msrb.mxu3 %vm716_vm9, %v708_v29 }
  0xf5   : > { %929 = vmatpush.xpose.msk.msrb.mxu3 %vm716_vm9, %v707_v26 }
  0xf8   : > { %930 = vmatmul.msk.f32.vlgmr.msrb.gmra.mxu3 %vm716_vm9, %v715_v33  ;;  %vm769_vm9 = vcmask 516096  }
 0x17b   : > { %v761_v30 = vpop.f32.mrf.mxu3 }
 0x17c   : > { %v764_v31 = vadd.f32 %v761_v30, %v476_v35 }
 0x17e   : > { %v766_v37 = vmul.f32 %v765_v63, %v764_v31 }
 0x180   : > { %v768_v39 = vadd.f32 %v767_v36, %v766_v37 }
 0x182   : > { %770 = vst.msk [vmem:[%s344_s26] sm:$0x1] %vm769_vm9, %v768_v39 }
 0x183   : > { %1065 = shalt.err (!%p1062_p8)
}
 0x184   : > { %945 = dma.vmem_to_hbm [thread:$0]  (%p1190_p5), %s783_s10, 16, %s785_s12, %s772_s13  }
 0x185 PF: > { %p957_p9 = scmp.ge.s32.totalorder %s1104_s30, 2  ;;  %s796_s22 = sand.u32 1, %s1092_s27  }
 0x186   : > { %s797_s24 = scalar_lea.sflag [#allocation3], %s796_s22 }
 0x187   : > { %p952_p10 = pnand %p957_p9, %p1194_p6 }
 0x189   : > { %p953_p11 = pneg %p952_p10 }
 0x18b   : > { %1087 = dma.done.wait (%p953_p11), %s797_s24, 16  }
 0x18c   : > { %1089 = vsyncadd (%p953_p11), %s797_s24, 4294967280  ;;  %p19_p12 = scmp.ge.s32.totalorder %s1177_s11, 4   ;;  %s1499_s27 = smov %s1096_s28 }
 0x18d   : > { %s1500_s28 = smov %s1100_s29  ;;  %s1501_s29 = smov %s1188_s14 }
 0x18e   : > { %s1502_s30 = smov %s1177_s11  ;;  %21 = sbr.rel (!%p19_p12) target bundleno = 4 (0x4), region = 98 }
 0x193   :  { %802 = vsyncpa [#allocation3], 1 }
 0x194   :  { %804 = vsyncpa [#allocation3 + $0x1], 1 }
 0x195   :  { %805 = vsyncpa [#allocation4], 1 }
 0x196   :  { %807 = vsyncpa [#allocation4 + $0x1], 1 }

</bundles_post_ra>
